<compile_context>
chip_gen: v7x
topology: tpu7x:2x2x1
jax: 0.10.0
libtpu: 0.0.40
codegen_flags: <defaults>
</compile_context>

<pallas_src>
import jax
import jax.numpy as jnp
from jax.experimental import pallas as pl
from jax.experimental.pallas import tpu as pltpu

IMPORTANCE_W = 0.3
DIFFICULTY_W = 0.4
AUTHENTICITY_W = 0.3

_QUALITY_KEYS = (
    'predicted_image_importance',
    'predicted_text_importance',
    'predicted_task_difficulty',
    'image_authenticity',
    'text_authenticity',
)


# --------------------------------------------------------------------------
# Kernel
# --------------------------------------------------------------------------
def _make_kernel(num_classes, tile_b, tile_c):
    """Per-(batch-tile, class-tile) kernel; accumulates class sums in out_ref."""
    needs_col_mask = (num_classes % tile_c) != 0

    def kernel(logits_ref, targets_ref, out_ref):
        k = pl.program_id(1)

        @pl.when(k == 0)
        def _():
            out_ref[...] = jnp.zeros_like(out_ref)

        # Cast in-kernel (inputs may be bf16); the VPU cast hides under the DMA.
        x = logits_ref[...].astype(jnp.float32)      # [tb, tc]
        t = targets_ref[...].astype(jnp.float32)     # [tb, tc]

        # Numerically stable binary_cross_entropy_with_logits (reduction='none'):
        #   max(x, 0) - x*t + log1p(exp(-|x|))
        # TODO(synk): on v6e/v7x a bf16-EUP (or VPU-polynomial) softplus would
        # halve transcendental pressure once the kernel stops being HBM-bound.
        bce = jnp.maximum(x, 0.0) - x * t + jnp.log1p(jnp.exp(-jnp.abs(x)))

        if needs_col_mask:
            # Mask garbage columns of the remainder class tile.
            col = jax.lax.broadcasted_iota(jnp.int32, (tile_b, tile_c), 1) + k * tile_c
            bce = jnp.where(col < num_classes, bce, 0.0)

        # Per-row partial class sum, accumulated in the resident output block.
        # (Garbage rows of a remainder batch tile are dropped on writeback.)
        out_ref[...] += jnp.sum(bce, axis=-1, keepdims=True)

    return kernel


# --------------------------------------------------------------------------
# Tile selection: size by bytes-per-grid-step, bound total VMEM.
# --------------------------------------------------------------------------
def _choose_tiles(batch, num_classes, bytes_per_elem, sublane):
    STEP_BUDGET = 6 * 1024 * 1024        # logits+targets bytes moved per grid step
    OUT_ROW = 2 * 128 * 4                # lane-padded f32 output row, double-buffered
    MAX_TB = 8192

    b_al = -(-batch // sublane) * sublane

    # Preferred: whole class dim as one block, batch tile sized by bytes.
    tb = STEP_BUDGET // (num_classes * bytes_per_elem + OUT_ROW)
    if tb >= sublane:
        tb = min(tb, b_al, MAX_TB)
        tb = max(sublane, (tb // sublane) * sublane)
        return int(tb), int(num_classes)

    # Very large C: also tile the class axis (multiples of 128, reduction last).
    tb = min(b_al, 256)
    tb = max(sublane, (tb // sublane) * sublane)
    tc = (STEP_BUDGET - tb * OUT_ROW) // (tb * bytes_per_elem)
    tc = max(128, (tc // 128) * 128)
    tc = min(tc, -(-num_classes // 128) * 128)
    return int(tb), int(tc)


# --------------------------------------------------------------------------
# Quality-weight combination (tiny O(B) work, done in the wrapper)
# --------------------------------------------------------------------------
def _quality_weights(quality_scores):
    """list-of-dicts (or a pre-packed [B, 5] array) -> clipped [B] weight."""
    if isinstance(quality_scores, (list, tuple)):
        cols = [
            jnp.stack([jnp.asarray(s[k], jnp.float32).reshape(()) for s in quality_scores])
            for k in _QUALITY_KEYS
        ]
        q = jnp.stack(cols, axis=-1)                 # [B, 5]
    else:
        q = jnp.asarray(quality_scores, jnp.float32)  # already [B, 5]

    avg_importance = (q[:, 0] + q[:, 1]) * 0.5
    difficulty = q[:, 2]
    avg_authenticity = (q[:, 3] + q[:, 4]) * 0.5
    w = (IMPORTANCE_W * avg_importance
         + DIFFICULTY_W * difficulty
         + AUTHENTICITY_W * avg_authenticity)
    return jnp.clip(w, 0.1, 2.0)


# --------------------------------------------------------------------------
# Public entry point
# --------------------------------------------------------------------------
def quality_aware_task_loss(logits, targets, quality_scores):
    """logits/targets: [B, C] (any float dtype); quality_scores: list of dicts
    of 5 scalars per sample (or a pre-packed [B, 5] array)."""
    B, C = logits.shape
    l_item = jnp.dtype(logits.dtype).itemsize
    t_item = jnp.dtype(targets.dtype).itemsize
    bytes_per_elem = l_item + t_item
    sublane = max(8, 32 // min(l_item, t_item))      # 8 f32 / 16 bf16 / 32 int8

    tb, tc = _choose_tiles(B, C, bytes_per_elem, sublane)
    nbt = pl.cdiv(B, tb)
    nct = pl.cdiv(C, tc)

    cost = pl.CostEstimate(
        flops=8 * B * C,
        transcendentals=2 * B * C,
        bytes_accessed=B * C * bytes_per_elem + B * 4,
    )

    class_sums = pl.pallas_call(
        _make_kernel(C, tb, tc),
        out_shape=jax.ShapeDtypeStruct((B, 1), jnp.float32),
        grid=(nbt, nct),
        in_specs=[
            pl.BlockSpec((tb, tc), lambda i, k: (i, k)),
            pl.BlockSpec((tb, tc), lambda i, k: (i, k)),
        ],
        out_specs=pl.BlockSpec((tb, 1), lambda i, k: (i, 0)),
        compiler_params=pltpu.CompilerParams(
            dimension_semantics=("parallel", "arbitrary"),
            vmem_limit_bytes=32 * 1024 * 1024,
        ),
        cost_estimate=cost,
    )(logits, targets)

    base = class_sums[:, 0] * (1.0 / C)              # per-sample mean over classes
    w = _quality_weights(quality_scores)             # [B]
    return jnp.mean(base * w)


# --------------------------------------------------------------------------
# Pure-JAX reference for sanity checking
# --------------------------------------------------------------------------
def _ref_loss(logits, targets, quality_arr):
    x = logits.astype(jnp.float32)
    t = targets.astype(jnp.float32)
    bce = jnp.maximum(x, 0.0) - x * t + jnp.log1p(jnp.exp(-jnp.abs(x)))
    base = jnp.mean(bce, axis=-1)
    q = quality_arr.astype(jnp.float32)
    avg_imp = (q[:, 0] + q[:, 1]) / 2.0
    diff = q[:, 2]
    avg_auth = (q[:, 3] + q[:, 4]) / 2.0
    w = jnp.clip(IMPORTANCE_W * avg_imp + DIFFICULTY_W * diff
                 + AUTHENTICITY_W * avg_auth, 0.1, 2.0)
    return jnp.mean(base * w)


if __name__ == "__main__":
    key = jax.random.PRNGKey(0)

    # --- main check: shapes implied by the module (list-of-dicts quality) ----
    B, C = 2, 4
    k1, k2, k3 = jax.random.split(key, 3)
    logits = jax.random.normal(k1, (B, C), dtype=jnp.float32)
    targets = (jax.random.uniform(k2, (B, C)) > 0.5).astype(jnp.float32)
    qvals = jax.random.uniform(k3, (B, 5), dtype=jnp.float32)
    quality_scores = [
        {
            'predicted_image_importance': qvals[b, 0],
            'predicted_text_importance': qvals[b, 1],
            'predicted_task_difficulty': qvals[b, 2],
            'image_authenticity': qvals[b, 3],
            'text_authenticity': qvals[b, 4],
        }
        for b in range(B)
    ]
    loss = jax.block_until_ready(quality_aware_task_loss(logits, targets, quality_scores))
    ref = jax.block_until_ready(_ref_loss(logits, targets, qvals))
    assert jnp.allclose(loss, ref, atol=1e-5, rtol=1e-5), (loss, ref)

    # --- secondary check: bf16 inputs, non-aligned batch (edge blocks) -------
    B2, C2 = 37, 160
    k4, k5, k6 = jax.random.split(jax.random.PRNGKey(1), 3)
    logits2 = jax.random.normal(k4, (B2, C2), dtype=jnp.bfloat16)
    targets2 = (jax.random.uniform(k5, (B2, C2)) > 0.5).astype(jnp.bfloat16)
    qvals2 = jax.random.uniform(k6, (B2, 5), dtype=jnp.float32)
    loss2 = jax.block_until_ready(quality_aware_task_loss(logits2, targets2, qvals2))
    ref2 = jax.block_until_ready(_ref_loss(logits2, targets2, qvals2))
    assert jnp.allclose(loss2, ref2, atol=1e-5, rtol=1e-5), (loss2, ref2)

    print("KERNEL_OK")
</pallas_src>

<mosaic_0001>
module attributes {stable_mosaic.version = 11 : i64} {
  func.func @kernel(%arg0: i32, %arg1: i32, %arg2: memref<8x4xf32, #tpu.memory_space<vmem>>, %arg3: memref<8x4xf32, #tpu.memory_space<vmem>>, %arg4: memref<8x1xf32, #tpu.memory_space<vmem>>) attributes {dimension_semantics = [#tpu.dimension_semantics<parallel>, #tpu.dimension_semantics<arbitrary>], iteration_bounds = array<i64: 1, 1>, scalar_prefetch = 0 : i64, scratch_operands = 0 : i64, tpu.core_type = #tpu.core_type<tc>, window_params = [{transform_indices = @transform_0, window_bounds = array<i64: 8, 4>}, {transform_indices = @transform_1, window_bounds = array<i64: 8, 4>}, {transform_indices = @transform_2, window_bounds = array<i64: 8, 1>}]} {
    %c0_i32 = arith.constant 0 : i32
    %0 = arith.cmpi eq, %arg1, %c0_i32 : i32
    %1 = arith.extui %0 : i1 to i32
    %c0_i32_0 = arith.constant 0 : i32
    %2 = arith.cmpi ne, %1, %c0_i32_0 : i32
    scf.if %2 {
      %cst_10 = arith.constant 0.000000e+00 : f32
      %20 = vector.broadcast %cst_10 : f32 to vector<8x1xf32>
      %c0_11 = arith.constant 0 : index
      %c0_12 = arith.constant 0 : index
      %21 = vector.load %arg4[%c0_11, %c0_12] : memref<8x1xf32, #tpu.memory_space<vmem>>, vector<8x1xf32>
      tpu.vector_store %arg4[%c0_11, %c0_12], %20 {strides = array<i32>} : memref<8x1xf32, #tpu.memory_space<vmem>>, vector<8x1xf32>,
    } else {
    }
    %c0 = arith.constant 0 : index
    %c0_1 = arith.constant 0 : index
    %3 = vector.load %arg2[%c0, %c0_1] : memref<8x4xf32, #tpu.memory_space<vmem>>, vector<8x4xf32>
    %c0_2 = arith.constant 0 : index
    %c0_3 = arith.constant 0 : index
    %4 = vector.load %arg3[%c0_2, %c0_3] : memref<8x4xf32, #tpu.memory_space<vmem>>, vector<8x4xf32>
    %cst = arith.constant 0.000000e+00 : f32
    %5 = vector.broadcast %cst : f32 to vector<8x4xf32>
    %6 = arith.maximumf %3, %5 : vector<8x4xf32>
    %7 = arith.mulf %3, %4 : vector<8x4xf32>
    %8 = arith.subf %6, %7 : vector<8x4xf32>
    %9 = math.absf %3 : vector<8x4xf32>
    %cst_4 = arith.constant 0.000000e+00 : f32
    %10 = vector.broadcast %cst_4 : f32 to vector<8x4xf32>
    %11 = arith.subf %10, %9 : vector<8x4xf32>
    %12 = math.exp %11 : vector<8x4xf32>
    %13 = math.log1p %12 : vector<8x4xf32>
    %14 = arith.addf %8, %13 : vector<8x4xf32>
    %c0_5 = arith.constant 0 : index
    %c0_6 = arith.constant 0 : index
    %15 = vector.load %arg4[%c0_5, %c0_6] : memref<8x1xf32, #tpu.memory_space<vmem>>, vector<8x1xf32>
    %cst_7 = arith.constant dense<0.000000e+00> : vector<8xf32>
    %16 = vector.multi_reduction <add>, %14, %cst_7 [1] : vector<8x4xf32> to vector<8xf32>
    %17 = vector.shape_cast %16 : vector<8xf32> to vector<8x1xf32>
    %18 = arith.addf %15, %17 : vector<8x1xf32>
    %c0_8 = arith.constant 0 : index
    %c0_9 = arith.constant 0 : index
    %19 = vector.load %arg4[%c0_8, %c0_9] : memref<8x1xf32, #tpu.memory_space<vmem>>, vector<8x1xf32>
    tpu.vector_store %arg4[%c0_8, %c0_9], %18 {strides = array<i32>} : memref<8x1xf32, #tpu.memory_space<vmem>>, vector<8x1xf32>,
    return
  }
  func.func @transform_0(%arg0: i32, %arg1: i32) -> (i32, i32) {
    %c0_i32 = arith.constant 0 : i32
    return %arg0, %arg1 : i32, i32
  }
  func.func @transform_1(%arg0: i32, %arg1: i32) -> (i32, i32) {
    %c0_i32 = arith.constant 0 : i32
    return %arg0, %arg1 : i32, i32
  }
  func.func @transform_2(%arg0: i32, %arg1: i32) -> (i32, i32) {
    %c0_i32 = arith.constant 0 : i32
    %c0_i32_0 = arith.constant 0 : i32
    return %arg0, %c0_i32 : i32, i32
  }
}

</mosaic_0001>

<bundles_post_ra>
// kernel: tpu_custom_call.1
= control target key start
LH: loop header
LB: loop body
LE: loop exit
PB: predicated region body
PF: predicated region fallthrough
CT: control target
= control target key end

     0   :  { %7 = vsyncpa [#allocation3], 0  ;;  %s169_s0 = inlined_call_operand.hbm [shape: f32[2,4], index: 0, kind: input, shape index: {}]   ;;  %s170_s1 = inlined_call_operand.vmem [shape: f32[2,4], index: 1, kind: input, shape index: {}]   ;;  %s171_s2 = inlined_call_operand.vmem [shape: f32[2,1], index: 2, kind: output, shape index: {}]  }
   0x1   :  { %12 = vsyncadd [#allocation3], 96  ;;  %s130_s9 = smov [#allocation2]   ;;  %s106_s13 = scalar_lea.hbm %s169_s0, 32 }
   0x2   :  { %s13_s10 = sshll.u32 %s130_s9, 4  ;;  %p107_p0 = scmp.ne.s32.totalorder %s169_s0, %s106_s13  ;;  %s14_s10 = int_to_ptr.vmem [resolvable:$true] %s13_s10 }
   0x3   :  { %p110_p1 = scmp.lt.u32.totalorder %s106_s13, %s169_s0 }
   0x5   :  { %p112_p2 = pnand %p110_p1, %p107_p0 }
   0x7   :  { %115 = shalt.err (!%p112_p2)
}
   0x8   :  { %s116_s18 = scalar_lea.vmem %s14_s10, 32  ;;  %s120_s19 = scalar_lea.vmem %s14_s10, 128 }
   0x9   :  { %p117_p3 = scmp.ne.s32.totalorder %s14_s10, %s116_s18  ;;  %p121_p4 = scmp.lt.s32.totalorder %s14_s10, %s14_s10 }
   0xa   :  { %p122_p5 = scmp.lt.s32.totalorder %s120_s19, %s116_s18 }
   0xc   :  { %p123_p6 = por %p122_p5, %p121_p4 }
   0xe   :  { %p124_p7 = pnand %p123_p6, %p117_p3 }
  0x10   :  { %127 = shalt.err (!%p124_p7)
}
  0x11   :  { %s131_s20 = smov 32   ;;  %s132_s21 = smov 2  }
  0x12   :  { %19 = dma.hbm_to_vmem [thread:$0]  %s169_s0, 32, %s14_s10, [#allocation3], %s131_s20, %s131_s20, %s132_s21  }
  0x13   :  { %128 = dma.done.wait [#allocation3], 128  }
  0x14   :  { %129 = vsyncadd [#allocation3], 4294967168  ;;  %vm29_vm0 = vcmask 7168   ;;  %v133_v0 = vmov 0.0   ;;  %v31_v1 = vld [vmem:[#allocation2] sm:$0xff]  ;;  %vm51_vm2 = vcmask 31744  }
  0x15   :  { %30 = vst.msk [vmem:[#allocation4] sm:$0xff] %vm29_vm0, %v133_v0  ;;  %v36_v2 = vand.u32 2147483647, %v31_v1  ;;  %v32_v8 = vld [vmem:[%s170_s1] sm:$0xff]  ;;  %v33_v10 = vmax.f32 %v31_v1, 0.0 }
  0x16   :  { %v34_v11 = vmul.f32 %v32_v8, %v31_v1 }
  0x17   :  { %v37_v3 = vsub.f32 0.0, %v36_v2 }
  0x18   :  { %v35_v15 = vsub.f32 %v33_v10, %v34_v11 }
  0x19   :  { %v38_v4 = vmul.f32 1.442695, %v37_v3 }
  0x1b   :  { %102 = vpow2.f32 %v38_v4 }
  0x1c   :  { %v50_v20 = vld [vmem:[#allocation4] sm:$0xff] }
  0x25   :  { %v103_v5 = vpop.eup %102 }
  0x26   :  { %v40_v6 = vadd.f32 1.0, %v103_v5  ;;  %v43_v7 = vmul.f32 -0.5, %v103_v5  ;;  %v46_v12 = vand.u32 2147483647, %v103_v5 }
  0x28   :  { %104 = vlog2.f32 %v40_v6  ;;  %v44_v9 = vadd.f32 1.0, %v43_v7  ;;  %vm47_vm1 = vcmp.lt.f32.partialorder %v46_v12, 0.0004427343 }
  0x2a   :  { %v45_v13 = vmul.f32 %v103_v5, %v44_v9 }
  0x32   :  { %v105_v14 = vpop.eup %104 }
  0x33   :  { %v42_v16 = vmul.f32 0.6931472, %v105_v14 }
  0x35   :  { %v48_v17 = vsel %vm47_vm1, %v45_v13, %v42_v16 }
  0x36   :  { %v49_v18 = vadd.f32 %v48_v17, %v35_v15 }
  0x38   :  { %v52_v19 = vsel %vm51_vm2, %v49_v18, 0.0 }
  0x39   :  { %53 = vadd.xlane.f32.xlu0 %v52_v19 }
  0xc6   :  { %v54_v21 = vpop.xlane.xlu0 %53 }
  0xc7   :  { %v55_v22 = vadd.f32 %v54_v21, %v50_v20 }
  0xc9   :  { %57 = vst.msk [vmem:[#allocation4] sm:$0xff] %vm29_vm0, %v55_v22 }
  0xd0   :  { %v75_v23 = vld [vmem:[#allocation4] sm:$0x3] }
  0xd1   :  { %76 = vst [vmem:[%s171_s2] sm:$0x3] %v75_v23 }
  0xd2   :  { %93 = vsyncpa [#allocation3], 1 }

</bundles_post_ra>
